<compile_context>
chip_gen: v6e
topology: v6e:2x2x1
jax: 0.10.0
libtpu: 0.0.40
codegen_flags: <defaults>
</compile_context>

<pallas_src>
import jax
import jax.numpy as jnp
from jax.experimental import pallas as pl
from jax.experimental.pallas import tpu as pltpu

BN_EPS = 1e-5
NEG_BIG = -1e30  # sentinel bias for padded softmax columns


def subtab_kernel(
    x_ref,
    w1_ref, b1_ref, g1_ref, be1_ref,
    w2_ref, b2_ref, g2_ref, be2_ref,
    w3_ref, b3_ref, g3_ref, be3_ref,
    w4_ref, b4_ref,
    o_ref,
    acc_ref,
):
    k = pl.program_id(0)

    @pl.when(k == 0)
    def _init():
        acc_ref[...] = jnp.zeros_like(acc_ref)

    # fc1 partial contraction for this K-tile: bf16 operands on the MXU, f32 accumulation.
    acc_ref[...] += jnp.dot(
        x_ref[...].astype(jnp.bfloat16), w1_ref[...],
        preferred_element_type=jnp.float32,
    )

    @pl.when(k == pl.num_programs(0) - 1)
    def _finalize():
        def linear(h, w_ref, b_ref):
            # bf16 matmul operands, f32 accumulate; bias add in f32.
            return jnp.dot(h.astype(jnp.bfloat16), w_ref[...],
                           preferred_element_type=jnp.float32) + b_ref[...]

        def batchnorm_train(h, g_ref, be_ref):
            # BatchNorm1d training mode: per-batch mean, biased variance, eps=1e-5.  All f32.
            mean = jnp.mean(h, axis=0, keepdims=True)
            var = jnp.mean((h - mean) * (h - mean), axis=0, keepdims=True)
            return (h - mean) * jax.lax.rsqrt(var + BN_EPS) * g_ref[...] + be_ref[...]

        h1 = batchnorm_train(jnp.maximum(acc_ref[...] + b1_ref[...], 0.0), g1_ref, be1_ref)
        h2 = batchnorm_train(jnp.maximum(linear(h1, w2_ref, b2_ref), 0.0), g2_ref, be2_ref)
        h3 = batchnorm_train(jnp.maximum(linear(h2, w3_ref, b3_ref), 0.0), g3_ref, be3_ref)

        # fc4 + softmax over last dim.  Padded output columns carry bias -1e30 -> exp == 0.
        logits = linear(h3, w4_ref, b4_ref)
        m = jnp.max(logits, axis=-1, keepdims=True)
        e = jnp.exp(logits - m)
        denom = jnp.sum(e, axis=-1, keepdims=True)
        o_ref[...] = e * pl.reciprocal(denom, approx=True)


def _plan_k(input_dim, k_tile=None):
    """Pick (k_tile, padded_k) so w1 is streamed in lane/sublane-aligned tiles.

    Small input_dim -> single grid step (w1 fully resident, no padding).  Large
    input_dim -> 128-aligned tile; if no candidate divides input_dim we pad the
    contraction dim with zeros (exact: zero columns add 0 to the accumulator).
    """
    if k_tile is not None:
        tk = k_tile
    elif input_dim <= 2048:
        return input_dim, input_dim
    else:
        tk = next((t for t in (2048, 1024, 512, 256) if input_dim % t == 0), 512)
    k_pad = ((input_dim + tk - 1) // tk) * tk
    return tk, k_pad


def subtab_forward(x, params, *, k_tile=None):
    (w1, b1, g1, be1, w2, b2, g2, be2, w3, b3, g3, be3, w4, b4) = params
    batch, input_dim = x.shape
    h1 = w1.shape[1]
    h2 = w2.shape[1]
    out_dim = w4.shape[1]

    # Lane-dense output: pad the final projection to a multiple of 128 columns.
    out_pad = max(128, ((out_dim + 127) // 128) * 128)
    if out_pad != out_dim:
        w4p = jnp.pad(w4, ((0, 0), (0, out_pad - out_dim)))
        b4p = jnp.pad(b4, ((0, 0), (0, out_pad - out_dim)), constant_values=NEG_BIG)
    else:
        w4p, b4p = w4, b4

    # Weights to bf16 for the MXU (halves weight DMA); biases / BN params stay f32.
    w2b = w2.astype(jnp.bfloat16)
    w3b = w3.astype(jnp.bfloat16)
    w4b = w4p.astype(jnp.bfloat16)

    # K-tiling plan for fc1 (zero-pad the contraction dim if the tile doesn't divide it).
    tk, k_pad = _plan_k(input_dim, k_tile)
    nk = k_pad // tk
    if k_pad != input_dim:
        x_in = jnp.pad(x, ((0, 0), (0, k_pad - input_dim)))
        w1b = jnp.pad(w1.astype(jnp.bfloat16), ((0, k_pad - input_dim), (0, 0)))
    else:
        x_in = x
        w1b = w1.astype(jnp.bfloat16)

    def resident(arr):
        # Full-extent block, same block index every grid step -> stays VMEM-resident.
        return pl.BlockSpec(arr.shape, lambda k: (0, 0))

    # Scoped-VMEM budget from the actual working set (default limit is far below physical).
    param_bytes = sum(int(a.size) * a.dtype.itemsize for a in
                      (b1, g1, be1, w2b, b2, g2, be2, w3b, b3, g3, be3, w4b, b4p))
    stream_bytes = 2 * (batch * tk * x.dtype.itemsize + tk * h1 * 2)  # double-buffered x / w1 tiles
    act_bytes = 4 * batch * (2 * h1 + 3 * h2 + 2 * out_pad)           # acc scratch + fused activations
    vmem_bytes = int(1.5 * (param_bytes + stream_bytes + act_bytes)) + (4 << 20)
    vmem_bytes = min(max(vmem_bytes, 16 << 20), 64 << 20)             # headroom under v7x 64 MiB

    flops = 2 * batch * (k_pad * h1 + h1 * h2 + h2 * h2 + h2 * out_pad)
    transcendentals = batch * (out_pad + 1) + (h1 + 2 * h2)           # exp + recip + rsqrt
    bytes_accessed = (x_in.nbytes + w1b.nbytes + param_bytes + batch * out_pad * 4)

    out = pl.pallas_call(
        subtab_kernel,
        out_shape=jax.ShapeDtypeStruct((batch, out_pad), jnp.float32),
        grid_spec=pltpu.PrefetchScalarGridSpec(
            num_scalar_prefetch=0,
            grid=(nk,),
            in_specs=[
                pl.BlockSpec((batch, tk), lambda k: (0, k)),   # x: K-tiled
                pl.BlockSpec((tk, h1), lambda k: (k, 0)),      # w1: K-tiled (streamed)
                resident(b1), resident(g1), resident(be1),
                resident(w2b), resident(b2), resident(g2), resident(be2),
                resident(w3b), resident(b3), resident(g3), resident(be3),
                resident(w4b), resident(b4p),
            ],
            out_specs=pl.BlockSpec((batch, out_pad), lambda k: (0, 0)),
            scratch_shapes=[pltpu.VMEM((batch, h1), jnp.float32)],
        ),
        compiler_params=pltpu.CompilerParams(
            dimension_semantics=("arbitrary",),
            vmem_limit_bytes=vmem_bytes,
        ),
        cost_estimate=pl.CostEstimate(
            flops=int(flops),
            transcendentals=int(transcendentals),
            bytes_accessed=int(bytes_accessed),
        ),
    )(x_in, w1b, b1, g1, be1, w2b, b2, g2, be2, w3b, b3, g3, be3, w4b, b4p)

    return out[:, :out_dim]


def init_params(key, input_dim, hidden_dim_1, hidden_dim_2, output_dim):
    """Deterministic synthetic parameters (shapes match nn.Linear / nn.BatchNorm1d)."""
    def linear_init(k, fan_in, fan_out):
        kw, kb = jax.random.split(k)
        bound = 1.0 / jnp.sqrt(fan_in)
        w = jax.random.uniform(kw, (fan_in, fan_out), jnp.float32, -bound, bound)  # (in, out)
        b = jax.random.uniform(kb, (1, fan_out), jnp.float32, -bound, bound)
        return w, b

    def bn_init(dim):
        return jnp.ones((1, dim), jnp.float32), jnp.zeros((1, dim), jnp.float32)

    k1, k2, k3, k4 = jax.random.split(key, 4)
    w1, b1 = linear_init(k1, input_dim, hidden_dim_1)
    g1, be1 = bn_init(hidden_dim_1)
    w2, b2 = linear_init(k2, hidden_dim_1, hidden_dim_2)
    g2, be2 = bn_init(hidden_dim_2)
    w3, b3 = linear_init(k3, hidden_dim_2, hidden_dim_2)
    g3, be3 = bn_init(hidden_dim_2)
    w4, b4 = linear_init(k4, hidden_dim_2, output_dim)
    return (w1, b1, g1, be1, w2, b2, g2, be2, w3, b3, g3, be3, w4, b4)


def _bn_ref(h, g, be):
    mean = jnp.mean(h, axis=0, keepdims=True)
    var = jnp.mean((h - mean) ** 2, axis=0, keepdims=True)
    return (h - mean) * jax.lax.rsqrt(var + BN_EPS) * g + be


def reference_forward_mixed(x, params):
    """Pure-JAX reference with the same bf16-weight/bf16-activation matmul policy."""
    (w1, b1, g1, be1, w2, b2, g2, be2, w3, b3, g3, be3, w4, b4) = params

    def dot_mixed(h, w):
        return jnp.dot(h.astype(jnp.bfloat16), w.astype(jnp.bfloat16),
                       preferred_element_type=jnp.float32)

    h = _bn_ref(jnp.maximum(dot_mixed(x, w1) + b1, 0.0), g1, be1)
    h = _bn_ref(jnp.maximum(dot_mixed(h, w2) + b2, 0.0), g2, be2)
    h = _bn_ref(jnp.maximum(dot_mixed(h, w3) + b3, 0.0), g3, be3)
    return jax.nn.softmax(dot_mixed(h, w4) + b4, axis=-1)


def reference_forward_f32(x, params):
    """Full-f32 reference mirroring the PyTorch module numerics (training-mode BN)."""
    (w1, b1, g1, be1, w2, b2, g2, be2, w3, b3, g3, be3, w4, b4) = params
    h = _bn_ref(jnp.maximum(x @ w1 + b1, 0.0), g1, be1)
    h = _bn_ref(jnp.maximum(h @ w2 + b2, 0.0), g2, be2)
    h = _bn_ref(jnp.maximum(h @ w3 + b3, 0.0), g3, be3)
    return jax.nn.softmax(h @ w4 + b4, axis=-1)


if __name__ == "__main__":
    # Small shapes consistent with the module (scaled-down hidden dims).
    BATCH = 8
    INPUT_DIM = 512    # RNA-seq gene count stand-in; k_tile=128 below exercises the
                       # streamed / accumulated fc1 path on a 4-step grid
    HIDDEN_1 = 256     # stands in for hidden_dim_1=1024
    HIDDEN_2 = 128     # stands in for hidden_dim_2=784
    OUTPUT_DIM = 10    # `output_dim` is a free name in the reference __init__; classifier-like pick
                       # (also exercises the lane-dense 128-column output padding path)

    key = jax.random.PRNGKey(0)
    kx, kp = jax.random.split(key)
    x = jax.random.normal(kx, (BATCH, INPUT_DIM), jnp.float32)
    params = init_params(kp, INPUT_DIM, HIDDEN_1, HIDDEN_2, OUTPUT_DIM)

    out = jax.block_until_ready(subtab_forward(x, params, k_tile=128))
    ref_mixed = jax.block_until_ready(reference_forward_mixed(x, params))
    ref_f32 = jax.block_until_ready(reference_forward_f32(x, params))

    assert out.shape == (BATCH, OUTPUT_DIM)
    # approx reciprocal in the softmax normalization -> relaxed sum-to-1 tolerance.
    assert jnp.allclose(jnp.sum(out, axis=-1), 1.0, atol=5e-3)
    # Same mixed-precision policy (accumulation order differs across K-tiles) -> close agreement.
    assert jnp.allclose(out, ref_mixed, atol=1e-2, rtol=1e-2)
    # bf16 weights vs. the true f32 module -> loose agreement.
    assert jnp.allclose(out, ref_f32, atol=6e-2, rtol=1e-1)

    print("KERNEL_OK")
</pallas_src>

<mosaic_0001>
module attributes {stable_mosaic.version = 11 : i64} {
  func.func @subtab_kernel(%arg0: i32, %arg1: memref<8x128xf32, #tpu.memory_space<vmem>>, %arg2: memref<128x256xbf16, #tpu.memory_space<vmem>>, %arg3: memref<1x256xf32, #tpu.memory_space<vmem>>, %arg4: memref<1x256xf32, #tpu.memory_space<vmem>>, %arg5: memref<1x256xf32, #tpu.memory_space<vmem>>, %arg6: memref<256x128xbf16, #tpu.memory_space<vmem>>, %arg7: memref<1x128xf32, #tpu.memory_space<vmem>>, %arg8: memref<1x128xf32, #tpu.memory_space<vmem>>, %arg9: memref<1x128xf32, #tpu.memory_space<vmem>>, %arg10: memref<128x128xbf16, #tpu.memory_space<vmem>>, %arg11: memref<1x128xf32, #tpu.memory_space<vmem>>, %arg12: memref<1x128xf32, #tpu.memory_space<vmem>>, %arg13: memref<1x128xf32, #tpu.memory_space<vmem>>, %arg14: memref<128x128xbf16, #tpu.memory_space<vmem>>, %arg15: memref<1x128xf32, #tpu.memory_space<vmem>>, %arg16: memref<8x128xf32, #tpu.memory_space<vmem>>, %arg17: memref<8x256xf32, #tpu.memory_space<vmem>>) attributes {dimension_semantics = [#tpu.dimension_semantics<arbitrary>], iteration_bounds = array<i64: 4>, scalar_prefetch = 0 : i64, scratch_operands = 1 : i64, tpu.core_type = #tpu.core_type<tc>, window_params = [{transform_indices = @transform_0, window_bounds = array<i64: 8, 128>}, {transform_indices = @transform_1, window_bounds = array<i64: 128, 256>}, {pipeline_mode = #tpu.pipeline_mode<synchronous>, transform_indices = @transform_2, window_bounds = array<i64: 1, 256>}, {pipeline_mode = #tpu.pipeline_mode<synchronous>, transform_indices = @transform_3, window_bounds = array<i64: 1, 256>}, {pipeline_mode = #tpu.pipeline_mode<synchronous>, transform_indices = @transform_4, window_bounds = array<i64: 1, 256>}, {pipeline_mode = #tpu.pipeline_mode<synchronous>, transform_indices = @transform_5, window_bounds = array<i64: 256, 128>}, {pipeline_mode = #tpu.pipeline_mode<synchronous>, transform_indices = @transform_6, window_bounds = array<i64: 1, 128>}, {pipeline_mode = #tpu.pipeline_mode<synchronous>, transform_indices = @transform_7, window_bounds = array<i64: 1, 128>}, {pipeline_mode = #tpu.pipeline_mode<synchronous>, transform_indices = @transform_8, window_bounds = array<i64: 1, 128>}, {pipeline_mode = #tpu.pipeline_mode<synchronous>, transform_indices = @transform_9, window_bounds = array<i64: 128, 128>}, {pipeline_mode = #tpu.pipeline_mode<synchronous>, transform_indices = @transform_10, window_bounds = array<i64: 1, 128>}, {pipeline_mode = #tpu.pipeline_mode<synchronous>, transform_indices = @transform_11, window_bounds = array<i64: 1, 128>}, {pipeline_mode = #tpu.pipeline_mode<synchronous>, transform_indices = @transform_12, window_bounds = array<i64: 1, 128>}, {pipeline_mode = #tpu.pipeline_mode<synchronous>, transform_indices = @transform_13, window_bounds = array<i64: 128, 128>}, {pipeline_mode = #tpu.pipeline_mode<synchronous>, transform_indices = @transform_14, window_bounds = array<i64: 1, 128>}, {pipeline_mode = #tpu.pipeline_mode<synchronous>, transform_indices = @transform_15, window_bounds = array<i64: 8, 128>}]} {
    %c0_i32 = arith.constant 0 : i32
    %0 = arith.cmpi eq, %arg0, %c0_i32 : i32
    %1 = arith.extui %0 : i1 to i32
    %c0_i32_0 = arith.constant 0 : i32
    %2 = arith.cmpi ne, %1, %c0_i32_0 : i32
    scf.if %2 {
      %cst_9 = arith.constant 0.000000e+00 : f32
      %13 = vector.broadcast %cst_9 : f32 to vector<8x256xf32>
      %c0_10 = arith.constant 0 : index
      %c0_11 = arith.constant 0 : index
      %14 = vector.load %arg17[%c0_10, %c0_11] : memref<8x256xf32, #tpu.memory_space<vmem>>, vector<8x256xf32>
      tpu.vector_store %arg17[%c0_10, %c0_11], %13 {strides = array<i32>} : memref<8x256xf32, #tpu.memory_space<vmem>>, vector<8x256xf32>,
    } else {
    }
    %c0 = arith.constant 0 : index
    %c0_1 = arith.constant 0 : index
    %3 = vector.load %arg17[%c0, %c0_1] : memref<8x256xf32, #tpu.memory_space<vmem>>, vector<8x256xf32>
    %c0_2 = arith.constant 0 : index
    %c0_3 = arith.constant 0 : index
    %4 = vector.load %arg1[%c0_2, %c0_3] : memref<8x128xf32, #tpu.memory_space<vmem>>, vector<8x128xf32>
    %5 = arith.truncf %4 : vector<8x128xf32> to vector<8x128xbf16>
    %c0_4 = arith.constant 0 : index
    %c0_5 = arith.constant 0 : index
    %6 = vector.load %arg2[%c0_4, %c0_5] : memref<128x256xbf16, #tpu.memory_space<vmem>>, vector<128x256xbf16>
    %cst = arith.constant dense<0.000000e+00> : vector<8x256xf32>
    %7 = tpu.matmul %5, %6, %cst {dimension_numbers = #tpu.dot_dimension_numbers<[1], [0], [0], [1], [0, 0, 1, 1], [], []>} : vector<8x128xbf16>, vector<128x256xbf16>, vector<8x256xf32> -> vector<8x256xf32>
    %8 = arith.addf %3, %7 : vector<8x256xf32>
    %c0_6 = arith.constant 0 : index
    %c0_7 = arith.constant 0 : index
    %9 = vector.load %arg17[%c0_6, %c0_7] : memref<8x256xf32, #tpu.memory_space<vmem>>, vector<8x256xf32>
    tpu.vector_store %arg17[%c0_6, %c0_7], %8 {strides = array<i32>} : memref<8x256xf32, #tpu.memory_space<vmem>>, vector<8x256xf32>,
    %c3_i32 = arith.constant 3 : i32
    %10 = arith.cmpi eq, %arg0, %c3_i32 : i32
    %11 = arith.extui %10 : i1 to i32
    %c0_i32_8 = arith.constant 0 : i32
    %12 = arith.cmpi ne, %11, %c0_i32_8 : i32
    scf.if %12 {
      %c0_9 = arith.constant 0 : index
      %c0_10 = arith.constant 0 : index
      %13 = vector.load %arg17[%c0_9, %c0_10] : memref<8x256xf32, #tpu.memory_space<vmem>>, vector<8x256xf32>
      %c0_11 = arith.constant 0 : index
      %c0_12 = arith.constant 0 : index
      %14 = vector.load %arg3[%c0_11, %c0_12] : memref<1x256xf32, #tpu.memory_space<vmem>>, vector<1x256xf32>
      %15 = vector.broadcast %14 : vector<1x256xf32> to vector<8x256xf32>
      %16 = arith.addf %13, %15 : vector<8x256xf32>
      %cst_13 = arith.constant 0.000000e+00 : f32
      %17 = vector.broadcast %cst_13 : f32 to vector<8x256xf32>
      %18 = arith.maximumf %16, %17 : vector<8x256xf32>
      %cst_14 = arith.constant dense<0.000000e+00> : vector<256xf32>
      %19 = vector.multi_reduction <add>, %18, %cst_14 [0] : vector<8x256xf32> to vector<256xf32>
      %20 = vector.shape_cast %19 : vector<256xf32> to vector<1x256xf32>
      %cst_15 = arith.constant 8.000000e+00 : f32
      %21 = vector.broadcast %cst_15 : f32 to vector<1x256xf32>
      %22 = arith.divf %20, %21 : vector<1x256xf32>
      %23 = vector.broadcast %22 : vector<1x256xf32> to vector<8x256xf32>
      %24 = arith.subf %18, %23 : vector<8x256xf32>
      %25 = vector.broadcast %22 : vector<1x256xf32> to vector<8x256xf32>
      %26 = arith.subf %18, %25 : vector<8x256xf32>
      %27 = arith.mulf %24, %26 : vector<8x256xf32>
      %cst_16 = arith.constant dense<0.000000e+00> : vector<256xf32>
      %28 = vector.multi_reduction <add>, %27, %cst_16 [0] : vector<8x256xf32> to vector<256xf32>
      %29 = vector.shape_cast %28 : vector<256xf32> to vector<1x256xf32>
      %cst_17 = arith.constant 8.000000e+00 : f32
      %30 = vector.broadcast %cst_17 : f32 to vector<1x256xf32>
      %31 = arith.divf %29, %30 : vector<1x256xf32>
      %32 = vector.broadcast %22 : vector<1x256xf32> to vector<8x256xf32>
      %33 = arith.subf %18, %32 : vector<8x256xf32>
      %cst_18 = arith.constant 9.99999974E-6 : f32
      %34 = vector.broadcast %cst_18 : f32 to vector<1x256xf32>
      %35 = arith.addf %31, %34 : vector<1x256xf32>
      %36 = math.rsqrt %35 : vector<1x256xf32>
      %37 = vector.broadcast %36 : vector<1x256xf32> to vector<8x256xf32>
      %38 = arith.mulf %33, %37 : vector<8x256xf32>
      %c0_19 = arith.constant 0 : index
      %c0_20 = arith.constant 0 : index
      %39 = vector.load %arg4[%c0_19, %c0_20] : memref<1x256xf32, #tpu.memory_space<vmem>>, vector<1x256xf32>
      %40 = vector.broadcast %39 : vector<1x256xf32> to vector<8x256xf32>
      %41 = arith.mulf %38, %40 : vector<8x256xf32>
      %c0_21 = arith.constant 0 : index
      %c0_22 = arith.constant 0 : index
      %42 = vector.load %arg5[%c0_21, %c0_22] : memref<1x256xf32, #tpu.memory_space<vmem>>, vector<1x256xf32>
      %43 = vector.broadcast %42 : vector<1x256xf32> to vector<8x256xf32>
      %44 = arith.addf %41, %43 : vector<8x256xf32>
      %45 = arith.truncf %44 : vector<8x256xf32> to vector<8x256xbf16>
      %c0_23 = arith.constant 0 : index
      %c0_24 = arith.constant 0 : index
      %46 = vector.load %arg6[%c0_23, %c0_24] : memref<256x128xbf16, #tpu.memory_space<vmem>>, vector<256x128xbf16>
      %cst_25 = arith.constant dense<0.000000e+00> : vector<8x128xf32>
      %47 = tpu.matmul %45, %46, %cst_25 {dimension_numbers = #tpu.dot_dimension_numbers<[1], [0], [0], [1], [0, 0, 1, 1], [], []>} : vector<8x256xbf16>, vector<256x128xbf16>, vector<8x128xf32> -> vector<8x128xf32>
      %c0_26 = arith.constant 0 : index
      %c0_27 = arith.constant 0 : index
      %48 = vector.load %arg7[%c0_26, %c0_27] : memref<1x128xf32, #tpu.memory_space<vmem>>, vector<1x128xf32>
      %49 = vector.broadcast %48 : vector<1x128xf32> to vector<8x128xf32>
      %50 = arith.addf %47, %49 : vector<8x128xf32>
      %cst_28 = arith.constant 0.000000e+00 : f32
      %51 = vector.broadcast %cst_28 : f32 to vector<8x128xf32>
      %52 = arith.maximumf %50, %51 : vector<8x128xf32>
      %cst_29 = arith.constant dense<0.000000e+00> : vector<128xf32>
      %53 = vector.multi_reduction <add>, %52, %cst_29 [0] : vector<8x128xf32> to vector<128xf32>
      %54 = vector.shape_cast %53 : vector<128xf32> to vector<1x128xf32>
      %cst_30 = arith.constant 8.000000e+00 : f32
      %55 = vector.broadcast %cst_30 : f32 to vector<1x128xf32>
      %56 = arith.divf %54, %55 : vector<1x128xf32>
      %57 = vector.broadcast %56 : vector<1x128xf32> to vector<8x128xf32>
      %58 = arith.subf %52, %57 : vector<8x128xf32>
      %59 = vector.broadcast %56 : vector<1x128xf32> to vector<8x128xf32>
      %60 = arith.subf %52, %59 : vector<8x128xf32>
      %61 = arith.mulf %58, %60 : vector<8x128xf32>
      %cst_31 = arith.constant dense<0.000000e+00> : vector<128xf32>
      %62 = vector.multi_reduction <add>, %61, %cst_31 [0] : vector<8x128xf32> to vector<128xf32>
      %63 = vector.shape_cast %62 : vector<128xf32> to vector<1x128xf32>
      %cst_32 = arith.constant 8.000000e+00 : f32
      %64 = vector.broadcast %cst_32 : f32 to vector<1x128xf32>
      %65 = arith.divf %63, %64 : vector<1x128xf32>
      %66 = vector.broadcast %56 : vector<1x128xf32> to vector<8x128xf32>
      %67 = arith.subf %52, %66 : vector<8x128xf32>
      %cst_33 = arith.constant 9.99999974E-6 : f32
      %68 = vector.broadcast %cst_33 : f32 to vector<1x128xf32>
      %69 = arith.addf %65, %68 : vector<1x128xf32>
      %70 = math.rsqrt %69 : vector<1x128xf32>
      %71 = vector.broadcast %70 : vector<1x128xf32> to vector<8x128xf32>
      %72 = arith.mulf %67, %71 : vector<8x128xf32>
      %c0_34 = arith.constant 0 : index
      %c0_35 = arith.constant 0 : index
      %73 = vector.load %arg8[%c0_34, %c0_35] : memref<1x128xf32, #tpu.memory_space<vmem>>, vector<1x128xf32>
      %74 = vector.broadcast %73 : vector<1x128xf32> to vector<8x128xf32>
      %75 = arith.mulf %72, %74 : vector<8x128xf32>
      %c0_36 = arith.constant 0 : index
      %c0_37 = arith.constant 0 : index
      %76 = vector.load %arg9[%c0_36, %c0_37] : memref<1x128xf32, #tpu.memory_space<vmem>>, vector<1x128xf32>
      %77 = vector.broadcast %76 : vector<1x128xf32> to vector<8x128xf32>
      %78 = arith.addf %75, %77 : vector<8x128xf32>
      %79 = arith.truncf %78 : vector<8x128xf32> to vector<8x128xbf16>
      %c0_38 = arith.constant 0 : index
      %c0_39 = arith.constant 0 : index
      %80 = vector.load %arg10[%c0_38, %c0_39] : memref<128x128xbf16, #tpu.memory_space<vmem>>, vector<128x128xbf16>
      %cst_40 = arith.constant dense<0.000000e+00> : vector<8x128xf32>
      %81 = tpu.matmul %79, %80, %cst_40 {dimension_numbers = #tpu.dot_dimension_numbers<[1], [0], [0], [1], [0, 0, 1, 1], [], []>} : vector<8x128xbf16>, vector<128x128xbf16>, vector<8x128xf32> -> vector<8x128xf32>
      %c0_41 = arith.constant 0 : index
      %c0_42 = arith.constant 0 : index
      %82 = vector.load %arg11[%c0_41, %c0_42] : memref<1x128xf32, #tpu.memory_space<vmem>>, vector<1x128xf32>
      %83 = vector.broadcast %82 : vector<1x128xf32> to vector<8x128xf32>
      %84 = arith.addf %81, %83 : vector<8x128xf32>
      %cst_43 = arith.constant 0.000000e+00 : f32
      %85 = vector.broadcast %cst_43 : f32 to vector<8x128xf32>
      %86 = arith.maximumf %84, %85 : vector<8x128xf32>
      %cst_44 = arith.constant dense<0.000000e+00> : vector<128xf32>
      %87 = vector.multi_reduction <add>, %86, %cst_44 [0] : vector<8x128xf32> to vector<128xf32>
      %88 = vector.shape_cast %87 : vector<128xf32> to vector<1x128xf32>
      %cst_45 = arith.constant 8.000000e+00 : f32
      %89 = vector.broadcast %cst_45 : f32 to vector<1x128xf32>
      %90 = arith.divf %88, %89 : vector<1x128xf32>
      %91 = vector.broadcast %90 : vector<1x128xf32> to vector<8x128xf32>
      %92 = arith.subf %86, %91 : vector<8x128xf32>
      %93 = vector.broadcast %90 : vector<1x128xf32> to vector<8x128xf32>
      %94 = arith.subf %86, %93 : vector<8x128xf32>
      %95 = arith.mulf %92, %94 : vector<8x128xf32>
      %cst_46 = arith.constant dense<0.000000e+00> : vector<128xf32>
      %96 = vector.multi_reduction <add>, %95, %cst_46 [0] : vector<8x128xf32> to vector<128xf32>
      %97 = vector.shape_cast %96 : vector<128xf32> to vector<1x128xf32>
      %cst_47 = arith.constant 8.000000e+00 : f32
      %98 = vector.broadcast %cst_47 : f32 to vector<1x128xf32>
      %99 = arith.divf %97, %98 : vector<1x128xf32>
      %100 = vector.broadcast %90 : vector<1x128xf32> to vector<8x128xf32>
      %101 = arith.subf %86, %100 : vector<8x128xf32>
      %cst_48 = arith.constant 9.99999974E-6 : f32
      %102 = vector.broadcast %cst_48 : f32 to vector<1x128xf32>
      %103 = arith.addf %99, %102 : vector<1x128xf32>
      %104 = math.rsqrt %103 : vector<1x128xf32>
      %105 = vector.broadcast %104 : vector<1x128xf32> to vector<8x128xf32>
      %106 = arith.mulf %101, %105 : vector<8x128xf32>
      %c0_49 = arith.constant 0 : index
      %c0_50 = arith.constant 0 : index
      %107 = vector.load %arg12[%c0_49, %c0_50] : memref<1x128xf32, #tpu.memory_space<vmem>>, vector<1x128xf32>
      %108 = vector.broadcast %107 : vector<1x128xf32> to vector<8x128xf32>
      %109 = arith.mulf %106, %108 : vector<8x128xf32>
      %c0_51 = arith.constant 0 : index
      %c0_52 = arith.constant 0 : index
      %110 = vector.load %arg13[%c0_51, %c0_52] : memref<1x128xf32, #tpu.memory_space<vmem>>, vector<1x128xf32>
      %111 = vector.broadcast %110 : vector<1x128xf32> to vector<8x128xf32>
      %112 = arith.addf %109, %111 : vector<8x128xf32>
      %113 = arith.truncf %112 : vector<8x128xf32> to vector<8x128xbf16>
      %c0_53 = arith.constant 0 : index
      %c0_54 = arith.constant 0 : index
      %114 = vector.load %arg14[%c0_53, %c0_54] : memref<128x128xbf16, #tpu.memory_space<vmem>>, vector<128x128xbf16>
      %cst_55 = arith.constant dense<0.000000e+00> : vector<8x128xf32>
      %115 = tpu.matmul %113, %114, %cst_55 {dimension_numbers = #tpu.dot_dimension_numbers<[1], [0], [0], [1], [0, 0, 1, 1], [], []>} : vector<8x128xbf16>, vector<128x128xbf16>, vector<8x128xf32> -> vector<8x128xf32>
      %c0_56 = arith.constant 0 : index
      %c0_57 = arith.constant 0 : index
      %116 = vector.load %arg15[%c0_56, %c0_57] : memref<1x128xf32, #tpu.memory_space<vmem>>, vector<1x128xf32>
      %117 = vector.broadcast %116 : vector<1x128xf32> to vector<8x128xf32>
      %118 = arith.addf %115, %117 : vector<8x128xf32>
      %cst_58 = arith.constant dense<0xFF800000> : vector<8xf32>
      %119 = vector.multi_reduction <maximumf>, %118, %cst_58 [1] : vector<8x128xf32> to vector<8xf32>
      %120 = vector.shape_cast %119 : vector<8xf32> to vector<8x1xf32>
      %121 = vector.broadcast %120 : vector<8x1xf32> to vector<8x128xf32>
      %122 = arith.subf %118, %121 : vector<8x128xf32>
      %123 = math.exp %122 : vector<8x128xf32>
      %cst_59 = arith.constant dense<0.000000e+00> : vector<8xf32>
      %124 = vector.multi_reduction <add>, %123, %cst_59 [1] : vector<8x128xf32> to vector<8xf32>
      %125 = vector.shape_cast %124 : vector<8xf32> to vector<8x1xf32>
      %126 = tpu.reciprocal %125 {approx = true} : vector<8x1xf32> -> vector<8x1xf32>
      %127 = vector.broadcast %126 : vector<8x1xf32> to vector<8x128xf32>
      %128 = arith.mulf %123, %127 : vector<8x128xf32>
      %c0_60 = arith.constant 0 : index
      %c0_61 = arith.constant 0 : index
      %129 = vector.load %arg16[%c0_60, %c0_61] : memref<8x128xf32, #tpu.memory_space<vmem>>, vector<8x128xf32>
      tpu.vector_store %arg16[%c0_60, %c0_61], %128 {strides = array<i32>} : memref<8x128xf32, #tpu.memory_space<vmem>>, vector<8x128xf32>,
    } else {
    }
    return
  }
  func.func @transform_0(%arg0: i32) -> (i32, i32) {
    %c0_i32 = arith.constant 0 : i32
    %c0_i32_0 = arith.constant 0 : i32
    return %c0_i32, %arg0 : i32, i32
  }
  func.func @transform_1(%arg0: i32) -> (i32, i32) {
    %c0_i32 = arith.constant 0 : i32
    %c0_i32_0 = arith.constant 0 : i32
    return %arg0, %c0_i32 : i32, i32
  }
  func.func @transform_2(%arg0: i32) -> (i32, i32) {
    %c0_i32 = arith.constant 0 : i32
    %c0_i32_0 = arith.constant 0 : i32
    %c0_i32_1 = arith.constant 0 : i32
    return %c0_i32, %c0_i32_0 : i32, i32
  }
  func.func @transform_3(%arg0: i32) -> (i32, i32) {
    %c0_i32 = arith.constant 0 : i32
    %c0_i32_0 = arith.constant 0 : i32
    %c0_i32_1 = arith.constant 0 : i32
    return %c0_i32, %c0_i32_0 : i32, i32
  }
  func.func @transform_4(%arg0: i32) -> (i32, i32) {
    %c0_i32 = arith.constant 0 : i32
    %c0_i32_0 = arith.constant 0 : i32
    %c0_i32_1 = arith.constant 0 : i32
    return %c0_i32, %c0_i32_0 : i32, i32
  }
  func.func @transform_5(%arg0: i32) -> (i32, i32) {
    %c0_i32 = arith.constant 0 : i32
    %c0_i32_0 = arith.constant 0 : i32
    %c0_i32_1 = arith.constant 0 : i32
    return %c0_i32, %c0_i32_0 : i32, i32
  }
  func.func @transform_6(%arg0: i32) -> (i32, i32) {
    %c0_i32 = arith.constant 0 : i32
    %c0_i32_0 = arith.constant 0 : i32
    %c0_i32_1 = arith.constant 0 : i32
    return %c0_i32, %c0_i32_0 : i32, i32
  }
  func.func @transform_7(%arg0: i32) -> (i32, i32) {
    %c0_i32 = arith.constant 0 : i32
    %c0_i32_0 = arith.constant 0 : i32
    %c0_i32_1 = arith.constant 0 : i32
    return %c0_i32, %c0_i32_0 : i32, i32
  }
  func.func @transform_8(%arg0: i32) -> (i32, i32) {
    %c0_i32 = arith.constant 0 : i32
    %c0_i32_0 = arith.constant 0 : i32
    %c0_i32_1 = arith.constant 0 : i32
    return %c0_i32, %c0_i32_0 : i32, i32
  }
  func.func @transform_9(%arg0: i32) -> (i32, i32) {
    %c0_i32 = arith.constant 0 : i32
    %c0_i32_0 = arith.constant 0 : i32
    %c0_i32_1 = arith.constant 0 : i32
    return %c0_i32, %c0_i32_0 : i32, i32
  }
  func.func @transform_10(%arg0: i32) -> (i32, i32) {
    %c0_i32 = arith.constant 0 : i32
    %c0_i32_0 = arith.constant 0 : i32
    %c0_i32_1 = arith.constant 0 : i32
    return %c0_i32, %c0_i32_0 : i32, i32
  }
  func.func @transform_11(%arg0: i32) -> (i32, i32) {
    %c0_i32 = arith.constant 0 : i32
    %c0_i32_0 = arith.constant 0 : i32
    %c0_i32_1 = arith.constant 0 : i32
    return %c0_i32, %c0_i32_0 : i32, i32
  }
  func.func @transform_12(%arg0: i32) -> (i32, i32) {
    %c0_i32 = arith.constant 0 : i32
    %c0_i32_0 = arith.constant 0 : i32
    %c0_i32_1 = arith.constant 0 : i32
    return %c0_i32, %c0_i32_0 : i32, i32
  }
  func.func @transform_13(%arg0: i32) -> (i32, i32) {
    %c0_i32 = arith.constant 0 : i32
    %c0_i32_0 = arith.constant 0 : i32
    %c0_i32_1 = arith.constant 0 : i32
    return %c0_i32, %c0_i32_0 : i32, i32
  }
  func.func @transform_14(%arg0: i32) -> (i32, i32) {
    %c0_i32 = arith.constant 0 : i32
    %c0_i32_0 = arith.constant 0 : i32
    %c0_i32_1 = arith.constant 0 : i32
    return %c0_i32, %c0_i32_0 : i32, i32
  }
  func.func @transform_15(%arg0: i32) -> (i32, i32) {
    %c0_i32 = arith.constant 0 : i32
    %c0_i32_0 = arith.constant 0 : i32
    %c0_i32_1 = arith.constant 0 : i32
    return %c0_i32, %c0_i32_0 : i32, i32
  }
}

</mosaic_0001>

<bundles_post_ra>
// kernel: tpu_custom_call.1
= control target key start
LH: loop header
LB: loop body
LE: loop exit
PB: predicated region body
PF: predicated region fallthrough
CT: control target
= control target key end

     0   :  { %s2328_s0 = inlined_call_operand.hbm [shape: f32[8,512], index: 0, kind: input, shape index: {}]   ;;  %s2329_s1 = inlined_call_operand.hbm [shape: bf16[512,256], index: 1, kind: input, shape index: {}]   ;;  %s2330_s2 = inlined_call_operand.vmem [shape: f32[1,256], index: 2, kind: input, shape index: {}]   ;;  %s2331_s3 = inlined_call_operand.vmem [shape: f32[1,256], index: 3, kind: input, shape index: {}]   ;;  %s2332_s4 = inlined_call_operand.vmem [shape: f32[1,256], index: 4, kind: input, shape index: {}]   ;;  %s2333_s5 = inlined_call_operand.hbm [shape: bf16[256,128], index: 5, kind: input, shape index: {}]   ;;  %s2334_s6 = inlined_call_operand.vmem [shape: f32[1,128], index: 6, kind: input, shape index: {}]   ;;  %s2335_s7 = inlined_call_operand.vmem [shape: f32[1,128], index: 7, kind: input, shape index: {}]   ;;  %s2336_s8 = inlined_call_operand.vmem [shape: f32[1,128], index: 8, kind: input, shape index: {}]   ;;  %s2337_s9 = inlined_call_operand.hbm [shape: bf16[128,128], index: 9, kind: input, shape index: {}]   ;;  %s2338_s10 = inlined_call_operand.vmem [shape: f32[1,128], index: 10, kind: input, shape index: {}]   ;;  %s2339_s11 = inlined_call_operand.vmem [shape: f32[1,128], index: 11, kind: input, shape index: {}]   ;;  %s2340_s12 = inlined_call_operand.vmem [shape: f32[1,128], index: 12, kind: input, shape index: {}]   ;;  %s2341_s13 = inlined_call_operand.hbm [shape: bf16[128,128], index: 13, kind: input, shape index: {}]   ;;  %s2342_s14 = inlined_call_operand.vmem [shape: f32[1,128], index: 14, kind: input, shape index: {}]   ;;  %s2343_s15 = inlined_call_operand.hbm [shape: f32[8,128], index: 15, kind: output, shape index: {}]  }
   0x1   :  { %2347 = sst [smem:[#allocation20_spill]] %s2328_s0 }
   0x2   :  { %2348 = sst [smem:[#allocation21_spill]] %s2333_s5 }
   0x3   :  { %2349 = sst [smem:[#allocation22_spill]] %s2337_s9 }
   0x4   :  { %2350 = sst [smem:[#allocation23_spill]] %s2341_s13 }
   0x5   :  { %2351 = sst [smem:[#allocation24_spill]] %s2342_s14 }
   0x6   :  { %2352 = sst [smem:[#allocation25_spill]] %s2343_s15 }
   0x7   :  { %20 = vsyncpa [#allocation4], 0 }
   0x8   :  { %22 = vsyncpa [#allocation4 + $0x1], 0 }
   0x9   :  { %23 = vsyncpa [#allocation7], 0 }
   0xa   :  { %25 = vsyncpa [#allocation7 + $0x1], 0 }
   0xb   :  { %26 = vsyncpa [#allocation10], 0 }
   0xc   :  { %27 = vsyncpa [#allocation5], 0  ;;  %s2038_s18 = smov 0   ;;  %s2040_s19 = smov 0  }
   0xd   :  { %s2042_s20 = smov 0   ;;  %s2044_s21 = smov 0  }
   0xe LB: > { %2353 = sst [smem:[#allocation18_spill]] %s1938_s20  ;;  %s2057_s22 = sadd.s32 4294967295, %s1942_s21   ;;  %s1942_s21 = sphi %s2044_s21, %s2377_s21   ;;  %s1938_s20 = sphi %s2042_s20, %s2374_s20   ;;  %s1934_s19 = sphi %s2040_s19, %s2376_s19   ;;  %s1930_s18 = sphi %s2038_s18, %s2375_s18  }
   0xf   : > { %p53_p0 = scmp.ne.s32.totalorder %s1934_s19, %s1930_s18  ;;  %p2344_p1 = scmp.eq.s32.totalorder %s2057_s22, 0 }
  0x10   : > { %p1416_p2 = scmp.ge.s32.totalorder %s1942_s21, 1  ;;  %p384_p3 = scmp.lt.s32.totalorder %s1942_s21, 5 }
  0x11   : > { %p2066_p5 = por %p2344_p1, %p53_p0  ;;  %s1944_s25 = smov [#allocation8]  }
  0x12   : > { %p2070_p6 = pnand %p1416_p2, %p384_p3  ;;  %s405_s26 = sshll.u32 %s1944_s25, 4  ;;  %s406_s26 = int_to_ptr.vmem [resolvable:$true] %s405_s26 }
  0x13   : > { %s2354_s23 = scalar_select %p2066_p5, 1, 0 }
  0x14   : > { %p1596_p7 = pneg %p2070_p6  ;;  %s1945_s28 = smov [#allocation9]  }
  0x15   : > { %s427_s29 = sshll.u32 %s1945_s28, 4  ;;  %s1946_s30 = smov [#allocation11]   ;;  %s428_s29 = int_to_ptr.vmem [resolvable:$true] %s427_s29 }
  0x16   : > { %p2078_p8 = pnand %p1596_p7, %p2344_p1  ;;  %s449_s16 = sshll.u32 %s1946_s30, 4  ;;  %s450_s16 = int_to_ptr.vmem [resolvable:$true] %s449_s16 }
  0x17   : > { %s1745_s17 = scalar_lea.vmem %s406_s26, 2048  ;;  %p1753_p13 = scmp.lt.s32.totalorder %s406_s26, %s406_s26 }
  0x18   : > { %p1736_p9 = pneg %p2078_p8  ;;  %p1746_p10 = scmp.ne.s32.totalorder %s406_s26, %s1745_s17 }
  0x19   : > { %p1754_p0 = scmp.lt.s32.totalorder %s1745_s17, %s1745_s17 }
  0x1a   : > { %p1748_p11 = pnand %p1746_p10, %p1736_p9 }
  0x1b   : > { %p1755_p2 = por %p1754_p0, %p1753_p13 }
  0x1c   : > { %p1749_p12 = pneg %p1748_p11 }
  0x1e   : > { %p1756_p3 = pnand %p1755_p2, %p1749_p12 }
  0x20   : > { %1759 = shalt.err (!%p1756_p3)
}
  0x21   : > { %s1947_s18 = smov 64   ;;  %s1948_s25 = smov 4  }
  0x22   : > { %s2357_s5 = sld [smem:[#allocation21_spill]]  ;;  %s1771_s15 = scalar_lea.vmem %s428_s29, 1024 }
  0x23   : > { %p1772_p7 = scmp.ne.s32.totalorder %s428_s29, %s1771_s15  ;;  %p1779_p4 = scmp.lt.s32.totalorder %s428_s29, %s428_s29 }
  0x24   : > { %p1780_p1 = scmp.lt.s32.totalorder %s1771_s15, %s1771_s15 }
  0x25   : > { %p1774_p10 = pnand %p1772_p7, %p1736_p9 }
  0x26   : > { %p1781_p13 = por %p1780_p1, %p1779_p4 }
  0x27   : > { %p1775_p11 = pneg %p1774_p10 }
  0x28   : > { %1599 = dma.hbm_to_vmem [thread:$0]  (!%p2078_p8), %s2357_s5, 2048, %s406_s26, [#allocation7], %s1947_s18, %s1947_s18, %s1948_s25  }
  0x29   : > { %p1782_p12 = pnand %p1781_p13, %p1775_p11 }
  0x2b   : > { %1785 = shalt.err (!%p1782_p12)
}
  0x2c   : > { %s2358_s9 = sld [smem:[#allocation22_spill]]  ;;  %s1797_s26 = scalar_lea.vmem %s450_s16, 1024 }
  0x2d   : > { %p1798_p0 = scmp.ne.s32.totalorder %s450_s16, %s1797_s26  ;;  %p1805_p7 = scmp.lt.s32.totalorder %s450_s16, %s450_s16 }
  0x2e   : > { %p1806_p10 = scmp.lt.s32.totalorder %s1797_s26, %s1797_s26 }
  0x2f   : > { %p1800_p2 = pnand %p1798_p0, %p1736_p9 }
  0x30   : > { %p1807_p5 = por %p1806_p10, %p1805_p7 }
  0x31   : > { %p1801_p3 = pneg %p1800_p2 }
  0x32   : > { %1602 = dma.hbm_to_vmem [thread:$0]  (!%p2078_p8), %s2358_s9, 1024, %s428_s29, [#allocation10], %s1947_s18, %s1947_s18, %s1948_s25  }
  0x33   : > { %p1808_p1 = pnand %p1807_p5, %p1801_p3 }
  0x35   : > { %1811 = shalt.err (!%p1808_p1)
}
  0x36   : > { %s2359_s13 = sld [smem:[#allocation23_spill]]  ;;  %s2109_s14 = sadd.s32 1, %s1942_s21  }
  0x37   : > { %s37_s29 = ssub.s32 %s1942_s21, %s2109_s14  ;;  %s40_s30 = sadd.s32 1, %s1938_s20 }
  0x38   : > { %p38_p4 = scmp.eq.s32.totalorder %s37_s29, 0  ;;  %p47_p5 = scmp.ne.s32.totalorder %s1938_s20, %s1934_s19 }
  0x39   : > { %p48_p9 = scmp.eq.s32.totalorder %s1942_s21, 0  ;;  %p1616_p11 = scmp.lt.s32.totalorder %s1942_s21, 4 }
  0x3a   : > { %s2119_s27 = scalar_select %p38_p4, %s1938_s20, %s40_s30  }
  0x3b   : > { %p49_p13 = por %p48_p9, %p47_p5  ;;  %s2122_s17 = sand.u32 1, %s1938_s20  }
  0x3c   : > { %1605 = dma.hbm_to_vmem [thread:$0]  (!%p2078_p8), %s2359_s13, 1024, %s450_s16, [#allocation10], %s1947_s18, %s1947_s18, %s1948_s25  }
  0x3d   : > { %2360 = sst [smem:[#allocation19_spill]] %s2119_s27  ;;  %s1421_s26 = sshll.u32 %s2122_s17, 3 }
  0x3e   : > { %s1422_s16 = sshll.u32 %s1942_s21, 7  ;;  %s2361_s0 = sld [smem:[#allocation20_spill]] }
  0x3f   : > { %s470_s28 = scalar_lea.vmem [#allocation3], %s1421_s26  ;;  %p2133_p8 = pnand %p1616_p11, %p49_p13 }
  0x40   : > { %s477_s29 = sshll.u32 %s470_s28, 4  ;;  %s467_s13 = scalar_lea.sflag [#allocation4], %s2122_s17  ;;  %s2131_s29 = int_to_ptr.vmem [resolvable:$true] %s477_s29 }
  0x41   : > { %p1814_p0 = pneg %p2133_p8 }
  0x44   : > { %s2129_s15 = scalar_lea.hbm %s2361_s0, %s1422_s16  ;;  %s1817_s18 = scalar_lea.hbm %s2361_s0, 512 }
  0x45   : > { %s1812_s27 = scalar_lea.hbm %s2129_s15, 128  ;;  %p1818_p7 = scmp.lt.s32.totalorder %s2129_s15, %s2361_s0 }
  0x46   : > { %p1813_p12 = scmp.ne.s32.totalorder %s2129_s15, %s1812_s27  ;;  %p1819_p10 = scmp.lt.s32.totalorder %s1817_s18, %s1812_s27 }
  0x48   : > { %p1815_p2 = pnand %p1814_p0, %p1813_p12  ;;  %p1820_p1 = por %p1819_p10, %p1818_p7 }
  0x4a   : > { %p1816_p3 = pneg %p1815_p2 }
  0x4c   : > { %p1821_p4 = pnand %p1820_p1, %p1816_p3 }
  0x4e   : > { %1824 = shalt.err (!%p1821_p4)
}
  0x4f   : > { %s1825_s9 = scalar_lea.vmem %s2131_s29, 128  ;;  %s1949_s26 = smov [#allocation3]  }
  0x50   : > { %p1826_p5 = scmp.ne.s32.totalorder %s2131_s29, %s1825_s9  ;;  %s1830_s16 = sshll.u32 %s1949_s26, 4  ;;  %s1831_s16 = int_to_ptr.vmem [resolvable:$false] %s1830_s16 }
  0x51   : > { %s1832_s5 = scalar_lea.vmem %s1831_s16, 256  ;;  %p1833_p13 = scmp.lt.s32.totalorder %s2131_s29, %s1831_s16 }
  0x52   : > { %p1828_p9 = pnand %p1826_p5, %p1814_p0  ;;  %p1834_p12 = scmp.lt.s32.totalorder %s1832_s5, %s1825_s9 }
  0x54   : > { %p1829_p11 = pneg %p1828_p9  ;;  %p1835_p2 = por %p1834_p12, %p1833_p13 }
  0x56   : > { %p1836_p7 = pnand %p1835_p2, %p1829_p11 }
  0x58   : > { %1839 = shalt.err (!%p1836_p7)
}
  0x59   : > { %1609 = dma.hbm_to_vmem [thread:$0]  (!%p2133_p8), %s2129_s15, 128, %s2131_s29, %s467_s13  }
  0x5a   : > { %s2363_s27 = sshll.u32 %s2122_s17, 7  ;;  %s1495_s28 = sshll.u32 %s1942_s21, 11 }
  0x5b   : > { %s488_s18 = scalar_lea.vmem [#allocation6], %s2363_s27  ;;  %s2172_s9 = scalar_lea.hbm %s2329_s1, %s1495_s28 }
  0x5c   : > { %s496_s25 = sshll.u32 %s488_s18, 4  ;;  %s2364_s16 = sand.u32 1, %s1942_s21   ;;  %s2166_s25 = int_to_ptr.vmem [resolvable:$true] %s496_s25 }
  0x5d   : > { %s2176_s0 = scalar_lea.sflag [#allocation7], %s2364_s16  ;;  %s1840_s20 = scalar_lea.hbm %s2172_s9, 2048 }
  0x5e   : > { %p1841_p3 = scmp.ne.s32.totalorder %s2172_s9, %s1840_s20  ;;  %s1845_s15 = scalar_lea.hbm %s2329_s1, 8192 }
  0x5f   : > { %p1846_p4 = scmp.lt.s32.totalorder %s2172_s9, %s2329_s1  ;;  %p1847_p5 = scmp.lt.s32.totalorder %s1845_s15, %s1840_s20 }
  0x60   : > { %p1843_p10 = pnand %p1841_p3, %p1814_p0 }
  0x61   : > { %p1848_p9 = por %p1847_p5, %p1846_p4 }
  0x62   : > { %p1844_p1 = pneg %p1843_p10 }
  0x64   : > { %p1849_p11 = pnand %p1848_p9, %p1844_p1 }
  0x66   : > { %1852 = shalt.err (!%p1849_p11)
}
  0x67   : > { %s1853_s21 = scalar_lea.vmem %s2166_s25, 2048  ;;  %s1950_s18 = smov [#allocation6]  }
  0x68   : > { %p1854_p13 = scmp.ne.s32.totalorder %s2166_s25, %s1853_s21  ;;  %s1858_s28 = sshll.u32 %s1950_s18, 4  ;;  %s1859_s28 = int_to_ptr.vmem [resolvable:$false] %s1858_s28 }
  0x69   : > { %s1860_s26 = scalar_lea.vmem %s1859_s28, 4096  ;;  %p1861_p7 = scmp.lt.s32.totalorder %s2166_s25, %s1859_s28 }
  0x6a   : > { %p1856_p12 = pnand %p1854_p13, %p1814_p0  ;;  %p1862_p3 = scmp.lt.s32.totalorder %s1860_s26, %s1853_s21 }
  0x6c   : > { %p1857_p2 = pneg %p1856_p12  ;;  %p1863_p10 = por %p1862_p3, %p1861_p7 }
  0x6e   : > { %p1864_p4 = pnand %p1863_p10, %p1857_p2 }
  0x70   : > { %1867 = shalt.err (!%p1864_p4)
}
  0x71   : > { %s1951_s20 = smov 128   ;;  %s1952_s5 = smov 8  }
  0x72   : > { %1612 = dma.hbm_to_vmem [thread:$0]  (!%p2133_p8), %s2172_s9, 2048, %s2166_s25, %s2176_s0, %s1951_s20, %s1951_s20, %s1952_s5  }
  0x73   : > { %508 = sbr.rel (%p2070_p6) target bundleno = 1477 (0x5c5), region = 80  ;;  %s510_s16 = sand.u32 (!%p2070_p6), 1, %s1934_s19  }
  0x74   : > { %s1428_s13 = sshll.u32 (!%p2070_p6), %s510_s16, 3  ;;  %s511_s17 = scalar_lea.sflag (!%p2070_p6), [#allocation4], %s510_s16 }
  0x75   : > { %s2204_s15 = scalar_lea.vmem (!%p2070_p6), [#allocation3], %s1428_s13  ;;  %p2365_p0 = scmp.ne.s32.totalorder (!%p2070_p6), %s2354_s23, 0 }
  0x78   : > { %1909 = dma.done.wait (%p2365_p0), %s511_s17, 128  }
  0x79   : > { %1911 = vsyncadd (%p2365_p0), %s511_s17, 4294967168  ;;  %s519_s29 = sand.u32 1, %s2057_s22   ;;  %s1429_s30 = sshll.u32 %s510_s16, 7 }
  0x7a   : > { %s520_s0 = scalar_lea.sflag [#allocation7], %s519_s29  ;;  %s2211_s25 = scalar_lea.vmem [#allocation6], %s1429_s30 }
  0x7b   : > { %1913 = dma.done.wait (%p2365_p0), %s520_s0, 2048  }
  0x7c   : > { %1915 = vsyncadd (%p2365_p0), %s520_s0, 4294965248  ;;  %p2366_p6 = scmp.eq.s32.totalorder %s2057_s22, 0 }
  0x7e   : > { %1917 = dma.done.wait (%p2366_p6), [#allocation7], 2048   ;;  %p2367_p8 = pmov %p2366_p6 }
  0x7f   : > { %p2368_p1 = pmov %p2366_p6 }
  0x80   : > { %1919 = vsyncadd (%p2367_p8), [#allocation7], 4294965248 }
  0x81   : > { %1921 = dma.done.wait (%p2368_p1), [#allocation10], 2048   ;;  %p2369_p5 = pmov %p2368_p1 }
  0x82   : > { %p2370_p9 = scmp.ne.s32.totalorder %s2057_s22, 0 }
  0x83   : > { %1923 = vsyncadd (%p2369_p5), [#allocation10], 4294965248 }
  0x84   : > { %587 = sbr.rel (%p2370_p9) target bundleno = 139 (0x8b), region = 104 }
  0x89   : > { %v1953_v0 = vmov 0.0  }
  0x8a   : > { %588 = vst [vmem:[#allocation2] sm:$0xff] %v1953_v0  ;;  %589 = vst [vmem:[#allocation2 + $0x8] sm:$0xff] %v1953_v0 }
  0x8b PF: > { %v1666_v1 = vld [vmem:[%s2211_s25 + $0x74] ss:$8 sps:$4 sm:$0xff]   ;;  %v1668_v2 = vld [vmem:[%s2211_s25 + $0x70] ss:$8 sps:$4 sm:$0xff]   ;;  %v1954_v3 = vmov 0   ;;  %p1450_p11 = scmp.ne.s32.totalorder %s2057_s22, 3 }
  0x8c   : > { %722 = vmatprep.mubr.bf16.mxu0 %v1954_v3  ;;  %690 = vmatprep.subr.bf16.mxu0 %v1666_v1  ;;  %v1669_v4 = vld [vmem:[%s2211_s25 + $0x64] ss:$8 sps:$4 sm:$0xff]   ;;  %v1671_v5 = vld [vmem:[%s2211_s25 + $0x60] ss:$8 sps:$4 sm:$0xff]   ;;  %v1672_v6 = vld [vmem:[%s2211_s25 + $0x54] ss:$8 sps:$4 sm:$0xff]  }
  0x8d   : > { %691 = vmatpush1.bf16.msra.mxu0 %v1668_v2  ;;  %v1674_v7 = vld [vmem:[%s2211_s25 + $0x50] ss:$8 sps:$4 sm:$0xff]   ;;  %v1675_v8 = vld [vmem:[%s2211_s25 + $0x44] ss:$8 sps:$4 sm:$0xff]   ;;  %v1677_v9 = vld [vmem:[%s2211_s25 + $0x40] ss:$8 sps:$4 sm:$0xff]  }
  0x8e   : > { %692 = vmatprep.subr.bf16.mxu0 %v1669_v4  ;;  %v1678_v10 = vld [vmem:[%s2211_s25 + $0x34] ss:$8 sps:$4 sm:$0xff]   ;;  %v1680_v11 = vld [vmem:[%s2211_s25 + $0x30] ss:$8 sps:$4 sm:$0xff]   ;;  %v1681_v12 = vld [vmem:[%s2211_s25 + $0x24] ss:$8 sps:$4 sm:$0xff]  }
  0x8f   : > { %v1683_v13 = vld [vmem:[%s2211_s25 + $0x20] ss:$8 sps:$4 sm:$0xff]   ;;  %v1684_v14 = vld [vmem:[%s2211_s25 + $0x14] ss:$8 sps:$4 sm:$0xff]   ;;  %v1686_v15 = vld [vmem:[%s2211_s25 + $0x10] ss:$8 sps:$4 sm:$0xff]  }
  0x90   : > { %v1687_v16 = vld [vmem:[%s2211_s25 + $0x4] ss:$8 sps:$4 sm:$0xff]   ;;  %v1689_v17 = vld [vmem:[%s2211_s25] ss:$8 sps:$4 sm:$0xff]   ;;  %v592_v18 = vld [vmem:[%s2204_s15] sm:$0xff]  ;;  %s2371_s9 = sld [smem:[#allocation24_spill]] (!%p1450_p11) }
  0x91   : > { %693 = vmatpush1.bf16.msra.mxu0 %v1671_v5  ;;  %v593_v19 = vpack.c.bf16 %v592_v18, %v592_v18  ;;  %v590_v20 = vld [vmem:[#allocation2] sm:$0xff]  ;;  %v591_v22 = vld [vmem:[#allocation2 + $0x8] sm:$0xff] }
  0x92   : > { %694 = vmatprep.subr.bf16.mxu0 %v1672_v6 }
  0x95   : > { %695 = vmatpush1.bf16.msra.mxu0 %v1674_v7 }
  0x96   : > { %696 = vmatprep.subr.bf16.mxu0 %v1675_v8 }
  0x99   : > { %697 = vmatpush1.bf16.msra.mxu0 %v1677_v9 }
  0x9a   : > { %698 = vmatprep.subr.bf16.mxu0 %v1678_v10 }
  0x9d   : > { %699 = vmatpush1.bf16.msra.mxu0 %v1680_v11 }
  0x9e   : > { %700 = vmatprep.subr.bf16.mxu0 %v1681_v12 }
  0xa1   : > { %701 = vmatpush1.bf16.msra.mxu0 %v1683_v13 }
  0xa2   : > { %702 = vmatprep.subr.bf16.mxu0 %v1684_v14 }
  0xa5   : > { %703 = vmatpush1.bf16.msra.mxu0 %v1686_v15 }
  0xa6   : > { %704 = vmatprep.subr.bf16.mxu0 %v1687_v16 }
  0xa9   : > { %705 = vmatpush1.bf16.msra.mxu0 %v1689_v17 }
  0xac   : > { %723 = vmatmul.mubr.bf16.vlgmr.msra.gmra.mxu0 %v593_v19 }
 0x16c   : > { %v724_v21 = vpop.f32.mrf.mxu0 }
 0x16d   : > { %v731_v23 = vadd.f32 %v724_v21, %v590_v20 }
 0x16e   : > { %v726_v24 = vpop.f32.mrf.mxu0  ;;  %738 = sbr.rel (%p1450_p11) target bundleno = 1456 (0x5b0), region = 108 }
 0x16f   : > { %733 = vst [vmem:[#allocation2] sm:$0xff] %v731_v23  ;;  %v732_v25 = vadd.f32 %v726_v24, %v591_v22 }
 0x170   : > { %v728_v26 = vpop.f32.mrf.mxu0 }
 0x171   : > { %734 = vst [vmem:[#allocation2 + $0x8] sm:$0xff] %v732_v25 }
 0x172   : > { %v729_v27 = vpop.f32.mrf.mxu0 }
 0x173   : > { %v1690_v28 = vld [vmem:[#allocation8 + $0x78] sm:$0xff]   ;;  %v1692_v30 = vld [vmem:[#allocation8 + $0x70] sm:$0xff]   ;;  %v1694_v32 = vld [vmem:[#allocation8 + $0x68] sm:$0xff]   ;;  %v743_v33 = vlaneseq  ;;  %vm1956_vm0 = vmmov 0  }
 0x174   : > { %v1691_v29 = vld [vmem:[#allocation8 + $0x38] sm:$0xff]   ;;  %1496 = vmatprep.subr.bf16.mxu0 %v1690_v28  ;;  %v1693_v31 = vld [vmem:[#allocation8 + $0x30] sm:$0xff]   ;;  %v1695_v34 = vld [vmem:[#allocation8 + $0x28] sm:$0xff]  }
 0x175   : > { %1497 = vmatpush3.bf16.msra.mxu0 %v1691_v29  ;;  %v1696_v35 = vld [vmem:[#allocation8 + $0x60] sm:$0xff]   ;;  %v744_v36 = vshrl.u32 %v743_v33, 7  ;;  %v1698_v38 = vld [vmem:[#allocation8 + $0x58] sm:$0xff]   ;;  %v1700_v42 = vld [vmem:[#allocation8 + $0x50] sm:$0xff]  }
 0x176   : > { %1498 = vmatprep.subr.bf16.mxu0 %v1692_v30  ;;  %v1697_v37 = vld [vmem:[#allocation8 + $0x20] sm:$0xff]   ;;  %v1699_v41 = vld [vmem:[#allocation8 + $0x18] sm:$0xff]   ;;  %v1701_v45 = vld [vmem:[#allocation8 + $0x10] sm:$0xff]  }
 0x177   : > { %v2245_v39 = vsub.s32 0, %v744_v36  ;;  %v2247_v40 = vsub.s32 1, %v744_v36  ;;  %v741_v44 = vld [vmem:[%s2330_s2] sm:$0x3]  ;;  %v1702_v49 = vld [vmem:[#allocation8 + $0x48] sm:$0xff]  }
 0x178   : > { %v740_v43 = vld [vmem:[#allocation2 + $0x8] sm:$0xff]  ;;  %v739_v48 = vld [vmem:[#allocation2] sm:$0xff] }
 0x179   : > { %1499 = vmatpush3.bf16.msra.mxu0 %v1693_v31  ;;  %v746_v46 = vrot.slane %v741_v44, %v2245_v39  ;;  %v750_v47 = vrot.slane %v741_v44, %v2247_v40  ;;  %v1703_v52 = vld [vmem:[#allocation8 + $0x8] sm:$0xff]   ;;  %v1704_v55 = vld [vmem:[#allocation8 + $0x40] sm:$0xff]  }
 0x17a   : > { %1500 = vmatprep.subr.bf16.mxu0 %v1694_v32  ;;  %v1705_v58 = vld [vmem:[#allocation8] sm:$0xff]  }
 0x17b   : > { %v754_v50 = vadd.f32 %v750_v47, %v740_v43  ;;  %v753_v51 = vadd.f32 %v746_v46, %v739_v48  ;;  %v796_v27 = vld [vmem:[%s2331_s3] sm:$0x3]  ;;  %v1955_v46 = vmov 0.0   ;;  %v1710_v48 = vld [vmem:[#allocation9 + $0x18] sm:$0xff]  }
 0x17c   : > { %v810_v28 = vld [vmem:[%s2332_s4] sm:$0x3]  ;;  %v805_v29 = vrot.slane %v796_v27, %v2247_v40  ;;  %v801_v31 = vrot.slane %v796_v27, %v2245_v39  ;;  %1536 = vmatprep.subr.bf16.mxu1 %v1955_v46  ;;  %1552 = vmatprep.mubr.msk.bf16.mxu1 %vm1956_vm0, %v1955_v46 }
 0x17d   : > { %1501 = vmatpush3.bf16.msra.mxu0 %v1695_v34  ;;  %v756_v53 = vmax.f32 %v754_v50, 0.0  ;;  %v755_v54 = vmax.f32 %v753_v51, 0.0  ;;  %v819_v34 = vrot.slane %v810_v28, %v2247_v40  ;;  %v1707_v40 = vld [vmem:[#allocation9 + $0x30] sm:$0xff]   ;;  %v1709_v47 = vld [vmem:[#allocation9 + $0x20] sm:$0xff]   ;;  %v1712_v50 = vld [vmem:[#allocation9 + $0x8] sm:$0xff]  }
 0x17e   : > { %1502 = vmatprep.subr.bf16.mxu0 %v1696_v35  ;;  %v815_v35 = vrot.slane %v810_v28, %v2245_v39  ;;  %v1708_v39 = vld [vmem:[#allocation9 + $0x28] sm:$0xff]   ;;  %v1713_v51 = vld [vmem:[#allocation9] sm:$0xff]  }
 0x17f   : > { %v763_v56 = vrot.slane %v756_v53, 4  ;;  %v757_v57 = vrot.slane %v755_v54, 4  ;;  %v1721_v27 = vld [vmem:[#allocation11] sm:$0xff]  }
 0x180   : > { %v1470_v28 = vld [vmem:[%s2338_s10] ss:$0 sm:$0xff] }
 0x181   : > { %1503 = vmatpush3.bf16.msra.mxu0 %v1697_v37  ;;  %v764_v59 = vadd.f32 %v763_v56, %v756_v53  ;;  %v758_v60 = vadd.f32 %v757_v57, %v755_v54 }
 0x182   : > { %1504 = vmatprep.subr.bf16.mxu0 %v1698_v38 }
 0x183   : > { %v765_v61 = vrot.slane %v764_v59, 2  ;;  %v759_v62 = vrot.slane %v758_v60, 2 }
 0x185   : > { %1505 = vmatpush3.bf16.msra.mxu0 %v1699_v41  ;;  %v766_v63 = vadd.f32 %v765_v61, %v764_v59  ;;  %v760_v0 = vadd.f32 %v759_v62, %v758_v60 }
 0x186   : > { %1506 = vmatprep.subr.bf16.mxu0 %v1700_v42 }
 0x187   : > { %v767_v1 = vrot.slane %v766_v63, 1  ;;  %v761_v2 = vrot.slane %v760_v0, 1 }
 0x189   : > { %1507 = vmatpush3.bf16.msra.mxu0 %v1701_v45  ;;  %v768_v3 = vadd.f32 %v767_v1, %v766_v63  ;;  %v762_v4 = vadd.f32 %v761_v2, %v760_v0  ;;  %v1706_v45 = vld [vmem:[#allocation9 + $0x38] sm:$0xff]  }
 0x18a   : > { %1508 = vmatprep.subr.bf16.mxu0 %v1702_v49  ;;  %1537 = vmatpush3.bf16.msra.mxu1 %v1706_v45  ;;  %v1711_v49 = vld [vmem:[#allocation9 + $0x10] sm:$0xff]  }
 0x18b   : > { %v771_v5 = vmul.f32 0.125, %v768_v3  ;;  %v770_v6 = vmul.f32 0.125, %v762_v4  ;;  %1538 = vmatprep.subr.bf16.mxu1 %v1955_v46 }
 0x18d   : > { %1509 = vmatpush3.bf16.msra.mxu0 %v1703_v52  ;;  %v773_v7 = vsub.f32 %v756_v53, %v771_v5  ;;  %v772_v8 = vsub.f32 %v755_v54, %v770_v6  ;;  %v1451_v53 = vld [vmem:[%s2334_s6] ss:$0 sm:$0xff] }
 0x18e   : > { %1510 = vmatprep.subr.bf16.mxu0 %v1704_v55  ;;  %1539 = vmatpush3.bf16.msra.mxu1 %v1707_v40 }
 0x18f   : > { %v775_v9 = vmul.f32 %v773_v7, %v773_v7  ;;  %v774_v10 = vmul.f32 %v772_v8, %v772_v8  ;;  %1540 = vmatprep.subr.bf16.mxu1 %v1955_v46 }
 0x191   : > { %1511 = vmatpush3.bf16.msra.mxu0 %v1705_v58  ;;  %v782_v11 = vrot.slane %v775_v9, 4  ;;  %v776_v12 = vrot.slane %v774_v10, 4 }
 0x192   : > { %1556 = vmatprep.subr.bf16.mxu0 %v1955_v46  ;;  %1541 = vmatpush3.bf16.msra.mxu1 %v1708_v39 }
 0x193   : > { %v783_v13 = vadd.f32 %v782_v11, %v775_v9  ;;  %v777_v14 = vadd.f32 %v776_v12, %v774_v10  ;;  %1542 = vmatprep.subr.bf16.mxu1 %v1955_v46 }
 0x195   : > { %v784_v15 = vrot.slane %v783_v13, 2  ;;  %v778_v16 = vrot.slane %v777_v14, 2 }
 0x196   : > { %1543 = vmatpush3.bf16.msra.mxu1 %v1709_v47 }
 0x197   : > { %v785_v17 = vadd.f32 %v784_v15, %v783_v13  ;;  %v779_v18 = vadd.f32 %v778_v16, %v777_v14  ;;  %1544 = vmatprep.subr.bf16.mxu1 %v1955_v46  ;;  %v1468_v14 = vld [vmem:[%s2335_s7] ss:$0 sm:$0xff] }
 0x198   : > { %v1469_v16 = vld [vmem:[%s2336_s8] ss:$0 sm:$0xff] }
 0x199   : > { %v786_v19 = vrot.slane %v785_v17, 1  ;;  %v780_v20 = vrot.slane %v779_v18, 1 }
 0x19a   : > { %1545 = vmatpush3.bf16.msra.mxu1 %v1710_v48 }
 0x19b   : > { %v787_v21 = vadd.f32 %v786_v19, %v785_v17  ;;  %v781_v22 = vadd.f32 %v780_v20, %v779_v18  ;;  %1546 = vmatprep.subr.bf16.mxu1 %v1955_v46  ;;  %v1714_v20 = vld [vmem:[#allocation11 + $0x38] sm:$0xff]  }
 0x19d   : > { %v789_v23 = vmul.f32 0.125, %v787_v21  ;;  %v788_v24 = vmul.f32 0.125, %v781_v22  ;;  %v1715_v21 = vld [vmem:[#allocation11 + $0x30] sm:$0xff]   ;;  %v1716_v22 = vld [vmem:[#allocation11 + $0x28] sm:$0xff]  }
 0x19e   : > { %1547 = vmatpush3.bf16.msra.mxu1 %v1711_v49 }
 0x19f   : > { %v791_v25 = vadd.f32 1e-05, %v789_v23  ;;  %v790_v26 = vadd.f32 1e-05, %v788_v24  ;;  %1548 = vmatprep.subr.bf16.mxu1 %v1955_v46  ;;  %v1717_v23 = vld [vmem:[#allocation11 + $0x20] sm:$0xff]   ;;  %v1718_v24 = vld [vmem:[#allocation11 + $0x18] sm:$0xff]  }
 0x1a1   : > { %1722 = vrsqrt.f32 %v791_v25  ;;  %v1719_v25 = vld [vmem:[#allocation11 + $0x10] sm:$0xff]  }
 0x1a2   : > { %1724 = vrsqrt.f32 %v790_v26  ;;  %1549 = vmatpush3.bf16.msra.mxu1 %v1712_v50  ;;  %v1720_v26 = vld [vmem:[#allocation11 + $0x8] sm:$0xff]  }
 0x1a3   : > { %1550 = vmatprep.subr.bf16.mxu1 %v1955_v46 }
 0x1a6   : > { %1551 = vmatpush3.bf16.msra.mxu1 %v1713_v51 }
 0x1ae   : > { %v1723_v30 = vpop.eup %1722 }
 0x1af   : > { %v1725_v32 = vpop.eup %1724  ;;  %v795_v33 = vmul.f32 %v1723_v30, %v773_v7 }
 0x1b0   : > { %v794_v36 = vmul.f32 %v1725_v32, %v772_v8 }
 0x1b1   : > { %v809_v37 = vmul.f32 %v805_v29, %v795_v33 }
 0x1b2   : > { %v808_v38 = vmul.f32 %v801_v31, %v794_v36 }
 0x1b3   : > { %v823_v41 = vadd.f32 %v819_v34, %v809_v37 }
 0x1b4   : > { %v822_v42 = vadd.f32 %v815_v35, %v808_v38 }
 0x1b5   : > { %v825_v43 = vpack.c.bf16 %v823_v41, %v823_v41 }
 0x1b6   : > { %v824_v44 = vpack.c.bf16 %v822_v42, %v822_v42 }
 0x1b7   : > { %993 = vmatprep.mubr.bf16.mxu0 %v825_v43 }
 0x1b8   : > { %994 = vmatmul.mubr.bf16.vlgmr.msra.gmra.mxu0 %v824_v44 }
 0x1b9   : > { %1572 = vmatprep.mubr.msk.bf16.mxu0 %vm1956_vm0, %v1955_v46  ;;  %1557 = vmatpush3.bf16.msra.mxu0 %v1714_v20 }
 0x1ba   : > { %1558 = vmatprep.subr.bf16.mxu0 %v1955_v46 }
 0x1bd   : > { %1559 = vmatpush3.bf16.msra.mxu0 %v1715_v21 }
 0x1be   : > { %1560 = vmatprep.subr.bf16.mxu0 %v1955_v46 }
 0x1c1   : > { %1561 = vmatpush3.bf16.msra.mxu0 %v1716_v22 }
 0x1c2   : > { %1562 = vmatprep.subr.bf16.mxu0 %v1955_v46 }
 0x1c5   : > { %1563 = vmatpush3.bf16.msra.mxu0 %v1717_v23 }
 0x1c6   : > { %1564 = vmatprep.subr.bf16.mxu0 %v1955_v46 }
 0x1c9   : > { %1565 = vmatpush3.bf16.msra.mxu0 %v1718_v24 }
 0x1ca   : > { %1566 = vmatprep.subr.bf16.mxu0 %v1955_v46 }
 0x1cd   : > { %1567 = vmatpush3.bf16.msra.mxu0 %v1719_v25 }
 0x1ce   : > { %1568 = vmatprep.subr.bf16.mxu0 %v1955_v46 }
 0x1d1   : > { %1569 = vmatpush3.bf16.msra.mxu0 %v1720_v26 }
 0x1d2   : > { %1570 = vmatprep.subr.bf16.mxu0 %v1955_v46 }
 0x1d5   : > { %1571 = vmatpush3.bf16.msra.mxu0 %v1721_v27 }
 0x278   : > { %v1512_v52 = vpop.f32.mrf.mxu0 }
 0x27a   : > { %v1513_v54 = vpop.f32.mrf.mxu0 }
 0x27b   : > { %v1514_v55 = vadd.f32 %v1513_v54, %v1512_v52 }
 0x27c   : > { %v1515_v56 = vpop.f32.mrf.mxu0 }
 0x27d   : > { %v996_v57 = vadd.f32 %v1514_v55, %v1451_v53  ;;  %v1479_v53 = vld [vmem:[%s2339_s11] ss:$0 sm:$0xff] }
 0x27e   : > { %v1516_v58 = vpop.f32.mrf.mxu0  ;;  %v1480_v55 = vld [vmem:[%s2340_s12] ss:$0 sm:$0xff] }
 0x27f   : > { %v1001_v59 = vmax.f32 %v996_v57, 0.0 }
 0x281   : > { %v1002_v60 = vrot.slane %v1001_v59, 4 }
 0x283   : > { %v1003_v61 = vadd.f32 %v1002_v60, %v1001_v59 }
 0x285   : > { %v1004_v62 = vrot.slane %v1003_v61, 2 }
 0x287   : > { %v1005_v63 = vadd.f32 %v1004_v62, %v1003_v61 }
 0x289   : > { %v1006_v0 = vrot.slane %v1005_v63, 1 }
 0x28b   : > { %v1007_v1 = vadd.f32 %v1006_v0, %v1005_v63 }
 0x28d   : > { %v1008_v2 = vmul.f32 0.125, %v1007_v1 }
 0x28f   : > { %v1009_v3 = vsub.f32 %v1001_v59, %v1008_v2  ;;  %v1481_v59 = vld [vmem:[%s2371_s9] ss:$0 sm:$0xff] }
 0x291   : > { %v1010_v4 = vmul.f32 %v1009_v3, %v1009_v3 }
 0x293   : > { %v1011_v5 = vrot.slane %v1010_v4, 4 }
 0x295   : > { %v1012_v6 = vadd.f32 %v1011_v5, %v1010_v4 }
 0x297   : > { %v1013_v7 = vrot.slane %v1012_v6, 2 }
 0x299   : > { %v1014_v8 = vadd.f32 %v1013_v7, %v1012_v6 }
 0x29b   : > { %v1015_v9 = vrot.slane %v1014_v8, 1 }
 0x29d   : > { %v1016_v10 = vadd.f32 %v1015_v9, %v1014_v8 }
 0x29f   : > { %v1017_v11 = vmul.f32 0.125, %v1016_v10 }
 0x2a1   : > { %v1018_v12 = vadd.f32 1e-05, %v1017_v11 }
 0x2a3   : > { %1726 = vrsqrt.f32 %v1018_v12 }
 0x2b0   : > { %v1727_v13 = vpop.eup %1726 }
 0x2b1   : > { %v1020_v15 = vmul.f32 %v1727_v13, %v1009_v3 }
 0x2b3   : > { %v1028_v17 = vmul.f32 %v1468_v14, %v1020_v15 }
 0x2b5   : > { %v1036_v18 = vadd.f32 %v1469_v16, %v1028_v17 }
 0x2b7   : > { %v1037_v19 = vpack.c.bf16 %v1036_v18, %v1036_v18 }
 0x2b9   : > { %1553 = vmatmul.mubr.bf16.vlgmr.msra.gmra.mxu1 %v1037_v19 }
 0x379   : > { %v1143_v29 = vpop.f32.mrf.mxu1 }
 0x37a   : > { %v1144_v30 = vadd.f32 %v1470_v28, %v1143_v29 }
 0x37b   : > { %v1554_v31 = vpop.f32.mrf.mxu1 }
 0x37c   : > { %v1149_v32 = vmax.f32 %v1144_v30, 0.0 }
 0x37d   : > { %v1146_v33 = vpop.f32.mrf.mxu1 }
 0x37e   : > { %v1150_v34 = vrot.slane %v1149_v32, 4 }
 0x37f   : > { %v1555_v35 = vpop.f32.mrf.mxu1 }
 0x380   : > { %v1151_v36 = vadd.f32 %v1150_v34, %v1149_v32 }
 0x382   : > { %v1152_v37 = vrot.slane %v1151_v36, 2 }
 0x384   : > { %v1153_v38 = vadd.f32 %v1152_v37, %v1151_v36 }
 0x386   : > { %v1154_v41 = vrot.slane %v1153_v38, 1 }
 0x388   : > { %v1155_v42 = vadd.f32 %v1154_v41, %v1153_v38 }
 0x38a   : > { %v1156_v43 = vmul.f32 0.125, %v1155_v42 }
 0x38c   : > { %v1157_v44 = vsub.f32 %v1149_v32, %v1156_v43 }
 0x38e   : > { %v1158_v45 = vmul.f32 %v1157_v44, %v1157_v44 }
 0x390   : > { %v1159_v46 = vrot.slane %v1158_v45, 4 }
 0x392   : > { %v1160_v40 = vadd.f32 %v1159_v46, %v1158_v45 }
 0x394   : > { %v1161_v39 = vrot.slane %v1160_v40, 2 }
 0x396   : > { %v1162_v47 = vadd.f32 %v1161_v39, %v1160_v40 }
 0x398   : > { %v1163_v48 = vrot.slane %v1162_v47, 1 }
 0x39a   : > { %v1164_v49 = vadd.f32 %v1163_v48, %v1162_v47 }
 0x39c   : > { %v1165_v50 = vmul.f32 0.125, %v1164_v49 }
 0x39e   : > { %v1166_v51 = vadd.f32 1e-05, %v1165_v50 }
 0x3a0   : > { %1728 = vrsqrt.f32 %v1166_v51 }
 0x3ad   : > { %v1729_v52 = vpop.eup %1728 }
 0x3ae   : > { %v1168_v54 = vmul.f32 %v1729_v52, %v1157_v44 }
 0x3b0   : > { %v1176_v56 = vmul.f32 %v1479_v53, %v1168_v54 }
 0x3b2   : > { %v1184_v57 = vadd.f32 %v1480_v55, %v1176_v56 }
 0x3b4   : > { %v1185_v58 = vpack.c.bf16 %v1184_v57, %v1184_v57 }
 0x3b6   : > { %1573 = vmatmul.mubr.bf16.vlgmr.msra.gmra.mxu0 %v1185_v58 }
 0x476   : > { %v1291_v60 = vpop.f32.mrf.mxu0 }
 0x477   : > { %v1292_v61 = vadd.f32 %v1481_v59, %v1291_v60 }
 0x478   : > { %v1574_v62 = vpop.f32.mrf.mxu0 }
 0x479   : > { %1297 = vmax.xlane.f32.xlu0 %v1292_v61 }
 0x47a   : > { %v1294_v63 = vpop.f32.mrf.mxu0 }
 0x47c   : > { %v1575_v0 = vpop.f32.mrf.mxu0 }
 0x502   : > { %v1298_v1 = vpop.xlane.xlu0 %1297 }
 0x503   : > { %v1299_v2 = vsub.f32 %v1292_v61, %v1298_v1 }
 0x505   : > { %v1300_v3 = vmul.f32 1.442695, %v1299_v2 }
 0x507   : > { %1730 = vpow2.f32 %v1300_v3 }
 0x514   : > { %v1731_v4 = vpop.eup %1730 }
 0x515   : > { %1302 = vadd.xlane.f32.xlu0 %v1731_v4 }
 0x59e   : > { %v1303_v5 = vpop.xlane.xlu0 %1302 }
 0x59f   : > { %1732 = vrcp.f32 %v1303_v5 }
 0x5ac   : > { %v1733_v6 = vpop.eup %1732 }
 0x5ad   : > { %v1305_v7 = vmul.f32 %v1733_v6, %v1731_v4 }
 0x5af   : > { %1306 = vst [vmem:[#allocation12] sm:$0xff] %v1305_v7 }
 0x5b0 PF: > { %p1620_p13 = scmp.eq.s32.totalorder %s2057_s22, 3  ;;  %s1957_s27 = smov [#allocation12]  }
 0x5b1   : > { %s1314_s21 = sshll.u32 %s1957_s27, 4  ;;  %s1315_s21 = int_to_ptr.vmem [resolvable:$true] %s1314_s21 }
 0x5b2   : > { %s1868_s18 = scalar_lea.vmem %s1315_s21, 128  ;;  %p1875_p3 = scmp.lt.s32.totalorder %s1315_s21, %s1315_s21 }
 0x5b3   : > { %p1869_p12 = scmp.ne.s32.totalorder %s1315_s21, %s1868_s18  ;;  %p1876_p10 = scmp.lt.s32.totalorder %s1868_s18, %s1868_s18 }
 0x5b5   : > { %p1870_p2 = pnand %p1869_p12, %p1620_p13  ;;  %p1877_p4 = por %p1876_p10, %p1875_p3 }
 0x5b7   : > { %p1871_p7 = pneg %p1870_p2 }
 0x5b9   : > { %p1878_p0 = pnand %p1877_p4, %p1871_p7 }
 0x5bb   : > { %1881 = shalt.err (!%p1878_p0)
}
 0x5bc   : > { %s2372_s20 = sld [smem:[#allocation25_spill]] }
 0x5c2   : > { %1593 = dma.vmem_to_hbm [thread:$0]  (%p1620_p13), %s1315_s21, 128, %s2372_s20, [#allocation5]  }
 0x5c3   : > { %1925 = dma.done.wait (%p1620_p13), [#allocation5], 128  }
 0x5c4   : > { %1927 = vsyncadd (%p1620_p13), [#allocation5], 4294967168 }
 0x5c5 PF: > { %s2373_s5 = sld [smem:[#allocation18_spill]]  ;;  %p30_p6 = scmp.ge.s32.totalorder %s2109_s14, 6  }
 0x5c6   : > { %s2374_s20 = sld [smem:[#allocation19_spill]]  ;;  %s2375_s18 = smov %s1934_s19 }
 0x5c7   : > { %s2377_s21 = smov %s2109_s14  ;;  %32 = sbr.rel (!%p30_p6) target bundleno = 14 (0xe), region = 150 }
 0x5cb   : > { %s2376_s19 = smov %s2373_s5 }
 0x5cc   :  { %1327 = vsyncpa [#allocation4], 1 }
 0x5cd   :  { %1329 = vsyncpa [#allocation4 + $0x1], 1 }
 0x5ce   :  { %1330 = vsyncpa [#allocation7], 1 }
 0x5cf   :  { %1332 = vsyncpa [#allocation7 + $0x1], 1 }
 0x5d0   :  { %1333 = vsyncpa [#allocation10], 1 }
 0x5d1   :  { %1334 = vsyncpa [#allocation5], 1 }
 0x5d2   :  { %1336 = vsyncpa [#allocation5 + $0x1], 1 }

</bundles_post_ra>
